<compile_context>
chip_gen: v6e
topology: v6e:2x2x1
jax: 0.10.0
libtpu: 0.0.40
codegen_flags: <defaults>
</compile_context>

<pallas_src>
import functools

import jax
import jax.numpy as jnp
from jax.experimental import pallas as pl
from jax.experimental.pallas import tpu as pltpu


def _round_up(x, m):
    return (x + m - 1) // m * m


# Explicit VMEM cap: safe on v5e/v6e (128 MiB physical) and v7x (64 MiB
# physical, 32 MiB default scoped); largest block set used here is ~5 MiB.
_VMEM_LIMIT_BYTES = 32 * 1024 * 1024
# Budget for the double-buffered bf16 weight (B) tile when collapsing K.
_WEIGHT_TILE_BUDGET = 6 * 1024 * 1024


# --------------------------------------------------------------------------
# Tile-size selection (adapted to the real problem sizes)
# --------------------------------------------------------------------------

def _choose_m(M):
    """Adapt the M tile to the real row count (deep layers have M = 2..32)."""
    if M >= 1024:
        tm = 512
    elif M >= 512:
        tm = 256
    elif M >= 128:
        tm = 128
    else:
        tm = _round_up(M, 16)          # bf16 sublane packing
    return _round_up(M, tm), tm


def _choose_tn(M, Np):
    """Fat N tiles in the weight-streaming regime; keep >=2 tiles when the
    padded width allows so both v7x TensorCores get work on the parallel N
    axis (v5e/v6e just pay one extra ~0.35us grid step)."""
    if M <= 128:
        if Np >= 256 and (Np // 2) % 128 == 0:
            return Np // 2
        return Np
    return 256 if Np % 256 == 0 else 128


def _choose_tk(Kp, tn):
    """Collapse the K reduction whenever the double-buffered bf16 B tile fits
    the budget (removes the per-K-step grid overhead for the M-tiny layers)."""
    if Kp * tn * 2 * 2 <= _WEIGHT_TILE_BUDGET:
        return Kp
    for t in (1024, 512, 256, 128):
        if Kp % t == 0 and t * tn * 2 * 2 <= _WEIGHT_TILE_BUDGET:
            return t
    return 128


# --------------------------------------------------------------------------
# Fused matmul kernels: o = act(a @ W_scaled + bias [+ residual])
# --------------------------------------------------------------------------

def _make_mm_kernel(act, has_res, single_k):
    def _epilogue(acc, bias, res, o_ref):
        y = acc + bias
        if has_res:
            y = jnp.maximum(y + res.astype(jnp.float32), 0.0)
        elif act == "relu":
            y = jnp.maximum(y, 0.0)
        elif act == "sigmoid":
            y = jax.nn.sigmoid(y)
        o_ref[...] = y.astype(o_ref.dtype)

    if single_k:
        if has_res:
            def kernel(a_ref, b_ref, c_ref, r_ref, o_ref):
                acc = jnp.dot(a_ref[...], b_ref[...],
                              preferred_element_type=jnp.float32)
                _epilogue(acc, c_ref[...], r_ref[...], o_ref)
        else:
            def kernel(a_ref, b_ref, c_ref, o_ref):
                acc = jnp.dot(a_ref[...], b_ref[...],
                              preferred_element_type=jnp.float32)
                _epilogue(acc, c_ref[...], None, o_ref)
    else:
        if has_res:
            def kernel(a_ref, b_ref, c_ref, r_ref, o_ref, acc_ref):
                @pl.when(pl.program_id(2) == 0)
                def _():
                    acc_ref[...] = jnp.zeros_like(acc_ref)

                acc_ref[...] += jnp.dot(a_ref[...], b_ref[...],
                                        preferred_element_type=jnp.float32)

                @pl.when(pl.program_id(2) == pl.num_programs(2) - 1)
                def _():
                    _epilogue(acc_ref[...], c_ref[...], r_ref[...], o_ref)
        else:
            def kernel(a_ref, b_ref, c_ref, o_ref, acc_ref):
                @pl.when(pl.program_id(2) == 0)
                def _():
                    acc_ref[...] = jnp.zeros_like(acc_ref)

                acc_ref[...] += jnp.dot(a_ref[...], b_ref[...],
                                        preferred_element_type=jnp.float32)

                @pl.when(pl.program_id(2) == pl.num_programs(2) - 1)
                def _():
                    _epilogue(acc_ref[...], c_ref[...], None, o_ref)
    return kernel


@functools.lru_cache(maxsize=None)
def _mm_call(Mp, Kp, Np, tm, tn, tk, act, has_res, out_dtype_name):
    out_dtype = jnp.dtype(out_dtype_name)
    single_k = (tk == Kp)
    kernel = _make_mm_kernel(act, has_res, single_k)

    if single_k:
        grid = (Mp // tm, Np // tn)
        in_specs = [
            pl.BlockSpec((tm, Kp), lambda i, j: (i, 0)),
            pl.BlockSpec((Kp, tn), lambda i, j: (0, j)),
            pl.BlockSpec((1, tn), lambda i, j: (0, j)),
        ]
        if has_res:
            in_specs.append(pl.BlockSpec((tm, tn), lambda i, j: (i, j)))
        out_specs = pl.BlockSpec((tm, tn), lambda i, j: (i, j))
        scratch = []
        semantics = ("parallel", "parallel")
    else:
        grid = (Mp // tm, Np // tn, Kp // tk)
        in_specs = [
            pl.BlockSpec((tm, tk), lambda i, j, k: (i, k)),
            pl.BlockSpec((tk, tn), lambda i, j, k: (k, j)),
            pl.BlockSpec((1, tn), lambda i, j, k: (0, j)),
        ]
        if has_res:
            in_specs.append(pl.BlockSpec((tm, tn), lambda i, j, k: (i, j)))
        out_specs = pl.BlockSpec((tm, tn), lambda i, j, k: (i, j))
        scratch = [pltpu.VMEM((tm, tn), jnp.float32)]
        semantics = ("parallel", "parallel", "arbitrary")

    return pl.pallas_call(
        kernel,
        out_shape=jax.ShapeDtypeStruct((Mp, Np), out_dtype),
        grid_spec=pltpu.PrefetchScalarGridSpec(
            num_scalar_prefetch=0,
            grid=grid,
            in_specs=in_specs,
            out_specs=out_specs,
            scratch_shapes=scratch),
        compiler_params=pltpu.CompilerParams(
            dimension_semantics=semantics,
            vmem_limit_bytes=_VMEM_LIMIT_BYTES),
    )


def fused_matmul(a, wp, act="none", residual=None, out_dtype=jnp.bfloat16):
    """a @ W (BN scale pre-folded into W) + bias, + activation.

    If `residual` is given, computes relu(a @ W + bias + residual).
    """
    M, K = a.shape
    Kp, Np = wp["w"].shape
    N = wp["n"]
    assert K == wp["kdim"]
    Mp, tm = _choose_m(M)
    tn = _choose_tn(M, Np)
    tk = _choose_tk(Kp, tn)

    a = a.astype(jnp.bfloat16)
    if Mp != M or Kp != K:
        a = jnp.pad(a, ((0, Mp - M), (0, Kp - K)))

    args = [a, wp["w"], wp["bias"]]
    if residual is not None:
        r = residual.astype(jnp.bfloat16)
        if Mp != M or Np != N:
            r = jnp.pad(r, ((0, Mp - M), (0, Np - N)))
        args.append(r)

    out = _mm_call(Mp, Kp, Np, tm, tn, tk, act, residual is not None,
                   jnp.dtype(out_dtype).name)(*args)
    if Mp != M or Np != N:
        out = out[:M, :N]
    return out


# --------------------------------------------------------------------------
# MaxPool 3x3 stride 2 pad 1: single pass over the padded input
# --------------------------------------------------------------------------

def _maxpool_kernel(x_ref, o_ref):
    # x_ref: (1, OH+1, 2, OW+1, 2*C) -- padded input with even/odd H split
    #        into a leading dim and even/odd W folded into the channel axis.
    # o_ref: (1, OH, OW, C)
    OH, OW, C = o_ref.shape[1], o_ref.shape[2], o_ref.shape[3]
    h_taps = ((slice(0, OH), 0), (slice(0, OH), 1), (slice(1, OH + 1), 0))
    w_taps = ((slice(0, OW), 0), (slice(0, OW), C), (slice(1, OW + 1), 0))
    m = None
    for hs, hp in h_taps:
        for ws, c0 in w_taps:
            tap = x_ref[:, hs, hp, ws, c0:c0 + C]
            m = tap if m is None else jnp.maximum(m, tap)
    o_ref[...] = m


@functools.lru_cache(maxsize=None)
def _maxpool_call(N, OH, OW, C, dtype_name):
    dt = jnp.dtype(dtype_name)
    return pl.pallas_call(
        _maxpool_kernel,
        out_shape=jax.ShapeDtypeStruct((N, OH, OW, C), dt),
        grid=(N,),
        in_specs=[pl.BlockSpec((1, OH + 1, 2, OW + 1, 2 * C),
                               lambda n: (n, 0, 0, 0, 0))],
        out_specs=pl.BlockSpec((1, OH, OW, C), lambda n: (n, 0, 0, 0)),
    )


def maxpool_3x3_s2(x):
    """nn.MaxPool2d(kernel_size=3, stride=2, padding=1) on NHWC input.

    The only HBM materialization is the padded input itself; the even/odd
    stride-2 structure is expressed through free contiguous reshapes.
    """
    N, H, W, C = x.shape
    assert H % 2 == 0 and W % 2 == 0
    OH, OW = H // 2, W // 2
    xp = jnp.pad(x, ((0, 0), (1, 1), (1, 1), (0, 0)),
                 constant_values=-jnp.inf)
    xr = xp.reshape(N, OH + 1, 2, OW + 1, 2 * C)
    return _maxpool_call(N, OH, OW, C, jnp.dtype(x.dtype).name)(xr)


# --------------------------------------------------------------------------
# Fused attention tail: score = sigmoid(h1 @ w2 + b2); feat = mean(x * score)
# --------------------------------------------------------------------------

def _att_pool_kernel(x_ref, h_ref, w2_ref, b2_ref, o_ref, *, inv_hw):
    # x_ref: (N, HW, C) bf16; h_ref: (N, HW, K2) bf16
    # w2_ref: (1, K2) f32;    b2_ref: (1, 1) f32;   o_ref: (N, 1, C) f32
    h = h_ref[...].astype(jnp.float32)
    s = jnp.sum(h * w2_ref[...], axis=-1, keepdims=True) + b2_ref[...]
    a = jax.nn.sigmoid(s)                                   # (N, HW, 1)
    x = x_ref[...].astype(jnp.float32)
    o_ref[...] = (jnp.sum(x * a, axis=1, keepdims=True) * inv_hw
                  ).astype(o_ref.dtype)


@functools.lru_cache(maxsize=None)
def _att_pool_call(N, HW, C, K2):
    return pl.pallas_call(
        functools.partial(_att_pool_kernel, inv_hw=1.0 / HW),
        out_shape=jax.ShapeDtypeStruct((N, 1, C), jnp.float32),
        grid=(1,),
        in_specs=[pl.BlockSpec((N, HW, C), lambda i: (0, 0, 0)),
                  pl.BlockSpec((N, HW, K2), lambda i: (0, 0, 0)),
                  pl.BlockSpec((1, K2), lambda i: (0, 0)),
                  pl.BlockSpec((1, 1), lambda i: (0, 0))],
        out_specs=pl.BlockSpec((N, 1, C), lambda i: (0, 0, 0)),
    )


def attention_head(x_nhwc, h1, w2, b2):
    """Fused: 1x1 conv (512->1) + sigmoid + attention multiply + global avg pool."""
    N, H, W, C = x_nhwc.shape
    HW = H * W
    K2 = h1.shape[-1]
    out = _att_pool_call(N, HW, C, K2)(
        x_nhwc.reshape(N, HW, C).astype(jnp.bfloat16),
        h1.reshape(N, HW, K2).astype(jnp.bfloat16),
        w2, b2)
    return out.reshape(N, C)


# --------------------------------------------------------------------------
# Parameter initialization (deterministic, synthetic — no checkpoint load)
# Conv+BN are folded; BN scale is multiplied into the bf16 weight columns and
# weights are padded to tile multiples ONCE at prep time.
# --------------------------------------------------------------------------

class _Keys:
    def __init__(self, seed=0):
        self._key = jax.random.PRNGKey(seed)

    def __call__(self):
        self._key, sub = jax.random.split(self._key)
        return sub


def _fold_bn(gamma, beta, mean, var, eps=1e-5):
    scale = gamma / jnp.sqrt(var + eps)
    return scale, beta - mean * scale


def _prep_weight(w, scale, bias):
    """Fold per-column scale into the weight, pad (K, N) to tile multiples,
    cast to bf16; bias kept as (1, Np) f32 for the epilogue."""
    K, N = w.shape
    Kp = _round_up(K, 128)
    Np = _round_up(N, 128)
    w = w * scale.reshape(1, N)
    # TODO(synk): weight-streaming layers (layer3/4, fc1/fc2) could store
    # weights int8 (v5e/v6e MXU) or fp8 (v7x MXU) with per-column dequant in
    # the epilogue for ~2x less weight HBM traffic; kept bf16 for numerics.
    wp = jnp.pad(w, ((0, Kp - K), (0, Np - N))).astype(jnp.bfloat16)
    bp = jnp.pad(bias.reshape(1, N).astype(jnp.float32), ((0, 0), (0, Np - N)))
    return {"w": wp, "bias": bp, "kdim": K, "n": N}


def conv_bn_params(kg, kh, kw, cin, cout):
    # Weight stored as (kh*kw*cin, cout) == torch weight.transpose(2,3,1,0).reshape(-1, cout)
    fan_in = kh * kw * cin
    w = jax.random.normal(kg(), (fan_in, cout), jnp.float32) / (fan_in ** 0.5)
    gamma = 1.0 + 0.05 * jax.random.normal(kg(), (cout,), jnp.float32)
    beta = 0.05 * jax.random.normal(kg(), (cout,), jnp.float32)
    mean = 0.05 * jax.random.normal(kg(), (cout,), jnp.float32)
    var = 1.0 + 0.05 * jnp.abs(jax.random.normal(kg(), (cout,), jnp.float32))
    scale, bias = _fold_bn(gamma, beta, mean, var)
    p = _prep_weight(w, scale, bias)
    p["k"] = (kh, kw)
    return p


def linear_params(kg, din, dout):
    w = jax.random.normal(kg(), (din, dout), jnp.float32) / (din ** 0.5)
    b = 0.05 * jax.random.normal(kg(), (dout,), jnp.float32)
    return _prep_weight(w, jnp.ones((dout,), jnp.float32), b)


def linear_bn_params(kg, din, dout):
    # Linear(din, dout) followed by BatchNorm1d(dout), folded into scale/bias.
    w = jax.random.normal(kg(), (din, dout), jnp.float32) / (din ** 0.5)
    b = 0.05 * jax.random.normal(kg(), (dout,), jnp.float32)
    gamma = 1.0 + 0.05 * jax.random.normal(kg(), (dout,), jnp.float32)
    beta = 0.05 * jax.random.normal(kg(), (dout,), jnp.float32)
    mean = 0.05 * jax.random.normal(kg(), (dout,), jnp.float32)
    var = 1.0 + 0.05 * jnp.abs(jax.random.normal(kg(), (dout,), jnp.float32))
    s = gamma / jnp.sqrt(var + 1e-5)
    bias = s * (b - mean) + beta
    return _prep_weight(w, s, bias)


def att2_params(kg, din):
    # Conv2d(512, 1, kernel_size=1) consumed by the fused attention-pool kernel.
    w = jax.random.normal(kg(), (din, 1), jnp.float32) / (din ** 0.5)
    b = 0.05 * jax.random.normal(kg(), (1,), jnp.float32)
    return {"w2": w.reshape(1, din), "b2": b.reshape(1, 1)}


def init_params(num_classes, seed=0):
    kg = _Keys(seed)
    params = {"stem": conv_bn_params(kg, 7, 7, 3, 64)}
    cin = 64
    layers = []
    # ResNet-50: (planes, num_blocks, stride)
    for planes, blocks, stride in [(64, 3, 1), (128, 4, 2), (256, 6, 2), (512, 3, 2)]:
        blk_list = []
        for b in range(blocks):
            s = stride if b == 0 else 1
            p = {"stride": s,
                 "conv1": conv_bn_params(kg, 1, 1, cin, planes),
                 "conv2": conv_bn_params(kg, 3, 3, planes, planes),
                 "conv3": conv_bn_params(kg, 1, 1, planes, planes * 4)}
            if b == 0:
                p["down"] = conv_bn_params(kg, 1, 1, cin, planes * 4)
            blk_list.append(p)
            cin = planes * 4
        layers.append(blk_list)
    params["layers"] = layers
    # attention: Conv2d(2048,512,1)+ReLU (matmul), then fused 512->1+sigmoid+pool
    params["att1"] = linear_params(kg, 2048, 512)
    params["att2"] = att2_params(kg, 512)
    # fc head: Linear+BN+ReLU+Dropout, Linear+BN+ReLU+Dropout, Linear
    params["fc1"] = linear_bn_params(kg, 2048, 1024)
    params["fc2"] = linear_bn_params(kg, 1024, 512)
    params["fc3"] = linear_params(kg, 512, num_classes)
    return params


# --------------------------------------------------------------------------
# Forward pass (glue: im2col/reshape/transpose; compute: Pallas kernels)
# --------------------------------------------------------------------------

def im2col(x, kh, kw, stride, pad):
    N, H, W, C = x.shape
    OH = (H + 2 * pad - kh) // stride + 1
    OW = (W + 2 * pad - kw) // stride + 1
    if kh == 1 and kw == 1 and pad == 0:
        xs = x[:, ::stride, ::stride, :] if stride > 1 else x
        return xs.reshape(N * OH * OW, C), (N, OH, OW)
    # TODO(synk): 3x3/7x7 im2col patches are still materialized by XLA glue
    # (in bf16); a direct tap-accumulating conv kernel would cut the layer1/2
    # activation HBM traffic further (matters most on v5e).
    xp = jnp.pad(x, ((0, 0), (pad, pad), (pad, pad), (0, 0)))
    cols = []
    for dh in range(kh):
        for dw in range(kw):
            cols.append(xp[:, dh:dh + stride * OH:stride,
                           dw:dw + stride * OW:stride, :])
    patches = jnp.stack(cols, axis=3)  # (N, OH, OW, kh*kw, C)
    return patches.reshape(N * OH * OW, kh * kw * C), (N, OH, OW)


def conv_bn(x, p, stride, pad, act):
    kh, kw = p["k"]
    a, (N, OH, OW) = im2col(x, kh, kw, stride, pad)
    y = fused_matmul(a, p, act)
    return y.reshape(N, OH, OW, p["n"])


def bottleneck(x, p):
    s = p["stride"]
    out = conv_bn(x, p["conv1"], 1, 0, "relu")
    out = conv_bn(out, p["conv2"], s, 1, "relu")
    if "down" in p:
        idt = conv_bn(x, p["down"], s, 0, "none")
    else:
        idt = x
    # conv3 is 1x1 stride 1: flatten directly; residual add + ReLU fused into
    # the matmul epilogue (no separate elementwise kernel / HBM round trip).
    Nb, OH, OW, Cmid = out.shape
    a = out.reshape(Nb * OH * OW, Cmid)
    r = idt.reshape(Nb * OH * OW, idt.shape[-1])
    y = fused_matmul(a, p["conv3"], residual=r)
    return y.reshape(Nb, OH, OW, p["conv3"]["n"])


def custom_resnet_forward(params, x_nchw):
    # NCHW (PyTorch convention) -> NHWC (internal layout), bf16 activations.
    x = jnp.transpose(x_nchw, (0, 2, 3, 1)).astype(jnp.bfloat16)
    # stem: conv 7x7 s2 p3 + BN + ReLU, maxpool 3x3 s2 p1
    x = conv_bn(x, params["stem"], 2, 3, "relu")
    x = maxpool_3x3_s2(x)
    # layer1..layer4
    for layer in params["layers"]:
        for blk in layer:
            x = bottleneck(x, blk)
    # attention branch: 1x1 conv (2048->512)+ReLU as a matmul, then fused
    # (512->1)+sigmoid+attention-multiply+global-average-pool kernel.
    N, H, W, C = x.shape
    xf = x.reshape(N * H * W, C)
    h1 = fused_matmul(xf, params["att1"], act="relu")        # (N*H*W, 512)
    feat = attention_head(x, h1, params["att2"]["w2"],
                          params["att2"]["b2"])              # (N, 2048) f32
    # fc head (BatchNorm1d folded into the matmul weights/bias)
    # TODO(synk): Dropout(0.5)/Dropout(0.3) are identity in inference mode.
    h = fused_matmul(feat, params["fc1"], act="relu")
    h = fused_matmul(h, params["fc2"], act="relu")
    logits = fused_matmul(h, params["fc3"], act="none", out_dtype=jnp.float32)
    return logits


if __name__ == "__main__":
    num_classes = 5
    params = init_params(num_classes, seed=0)
    # small input consistent with the module: batch=2, 3 channels, 64x64 spatial
    x = jax.random.normal(jax.random.PRNGKey(0), (2, 3, 64, 64), jnp.float32)
    out = custom_resnet_forward(params, x)
    out = jax.block_until_ready(out)
    assert out.shape == (2, num_classes), out.shape
    assert bool(jnp.all(jnp.isfinite(out)))
    print("KERNEL_OK")
</pallas_src>

<mosaic_0001>
module attributes {stable_mosaic.version = 11 : i64} {
  func.func @kernel(%arg0: i32, %arg1: i32, %arg2: memref<512x256xbf16, #tpu.memory_space<vmem>>, %arg3: memref<256x128xbf16, #tpu.memory_space<vmem>>, %arg4: memref<1x128xf32, #tpu.memory_space<vmem>>, %arg5: memref<512x128xbf16, #tpu.memory_space<vmem>>) attributes {dimension_semantics = [#tpu.dimension_semantics<parallel>, #tpu.dimension_semantics<parallel>], iteration_bounds = array<i64: 4, 1>, scalar_prefetch = 0 : i64, scratch_operands = 0 : i64, tpu.core_type = #tpu.core_type<tc>, window_params = [{transform_indices = @transform_0, window_bounds = array<i64: 512, 256>}, {transform_indices = @transform_1, window_bounds = array<i64: 256, 128>}, {transform_indices = @transform_2, window_bounds = array<i64: 1, 128>}, {transform_indices = @transform_3, window_bounds = array<i64: 512, 128>}]} {
    %c0 = arith.constant 0 : index
    %c0_0 = arith.constant 0 : index
    %0 = vector.load %arg2[%c0, %c0_0] : memref<512x256xbf16, #tpu.memory_space<vmem>>, vector<512x256xbf16>
    %c0_1 = arith.constant 0 : index
    %c0_2 = arith.constant 0 : index
    %1 = vector.load %arg3[%c0_1, %c0_2] : memref<256x128xbf16, #tpu.memory_space<vmem>>, vector<256x128xbf16>
    %cst = arith.constant dense<0.000000e+00> : vector<512x128xf32>
    %2 = tpu.matmul %0, %1, %cst {dimension_numbers = #tpu.dot_dimension_numbers<[1], [0], [0], [1], [0, 0, 1, 1], [], []>} : vector<512x256xbf16>, vector<256x128xbf16>, vector<512x128xf32> -> vector<512x128xf32>
    %c0_3 = arith.constant 0 : index
    %c0_4 = arith.constant 0 : index
    %3 = vector.load %arg4[%c0_3, %c0_4] : memref<1x128xf32, #tpu.memory_space<vmem>>, vector<1x128xf32>
    %4 = vector.broadcast %3 : vector<1x128xf32> to vector<512x128xf32>
    %5 = arith.addf %2, %4 : vector<512x128xf32>
    %cst_5 = arith.constant 0.000000e+00 : f32
    %6 = vector.broadcast %cst_5 : f32 to vector<512x128xf32>
    %7 = arith.maximumf %5, %6 : vector<512x128xf32>
    %8 = arith.truncf %7 : vector<512x128xf32> to vector<512x128xbf16>
    %c0_6 = arith.constant 0 : index
    %c0_7 = arith.constant 0 : index
    %9 = vector.load %arg5[%c0_6, %c0_7] : memref<512x128xbf16, #tpu.memory_space<vmem>>, vector<512x128xbf16>
    tpu.vector_store %arg5[%c0_6, %c0_7], %8 {strides = array<i32>} : memref<512x128xbf16, #tpu.memory_space<vmem>>, vector<512x128xbf16>,
    return
  }
  func.func @transform_0(%arg0: i32, %arg1: i32) -> (i32, i32) {
    %c0_i32 = arith.constant 0 : i32
    %c0_i32_0 = arith.constant 0 : i32
    return %arg0, %c0_i32 : i32, i32
  }
  func.func @transform_1(%arg0: i32, %arg1: i32) -> (i32, i32) {
    %c0_i32 = arith.constant 0 : i32
    %c0_i32_0 = arith.constant 0 : i32
    return %c0_i32, %arg1 : i32, i32
  }
  func.func @transform_2(%arg0: i32, %arg1: i32) -> (i32, i32) {
    %c0_i32 = arith.constant 0 : i32
    %c0_i32_0 = arith.constant 0 : i32
    return %c0_i32, %arg1 : i32, i32
  }
  func.func @transform_3(%arg0: i32, %arg1: i32) -> (i32, i32) {
    %c0_i32 = arith.constant 0 : i32
    return %arg0, %arg1 : i32, i32
  }
}

</mosaic_0001>

<bundles_post_ra>
// kernel: tpu_custom_call.1
= control target key start
LH: loop header
LB: loop body
LE: loop exit
PB: predicated region body
PF: predicated region fallthrough
CT: control target
= control target key end

     0   :  { %8 = vsyncpa [#allocation3], 0  ;;  %s2755_s0 = inlined_call_operand.hbm [shape: bf16[2048,256], index: 0, kind: input, shape index: {}]   ;;  %s2756_s1 = inlined_call_operand.hbm [shape: bf16[256,128], index: 1, kind: input, shape index: {}]   ;;  %s2757_s2 = inlined_call_operand.vmem [shape: f32[1,128], index: 2, kind: input, shape index: {}]   ;;  %s2758_s3 = inlined_call_operand.hbm [shape: bf16[2048,128], index: 3, kind: output, shape index: {}]  }
   0x1   :  { %10 = vsyncpa [#allocation3 + $0x1], 0 }
   0x2   :  { %11 = vsyncpa [#allocation6], 0 }
   0x3   :  { %12 = vsyncpa [#allocation4], 0 }
   0x4   :  { %14 = vsyncpa [#allocation4 + $0x1], 0  ;;  %s2373_s12 = smov 0   ;;  %s2375_s13 = smov 0  }
   0x5   :  { %s2377_s14 = smov 0   ;;  %s2379_s15 = smov 0  }
   0x6   :  { %s2381_s16 = smov 0   ;;  %s2383_s17 = smov 0  }
   0x7 LB: > { %s1557_s18 = sadd.s32 4294967295, %s2341_s17   ;;  %s1558_s19 = sadd.s32 4294967294, %s2341_s17   ;;  %s2341_s17 = sphi %s2383_s17, %s20_s17   ;;  %s2337_s16 = sphi %s2381_s16, %s2775_s16   ;;  %s2333_s15 = sphi %s2379_s15, %s2774_s15   ;;  %s2329_s14 = sphi %s2377_s14, %s2773_s14   ;;  %s2325_s13 = sphi %s2375_s13, %s2772_s13   ;;  %s2321_s12 = sphi %s2373_s12, %s2771_s12  }
   0x8   : > { %p52_p0 = scmp.ne.s32.totalorder %s2325_s13, %s2321_s12  ;;  %p2407_p1 = scmp.eq.s32.totalorder %s1557_s18, 0 }
   0x9   : > { %p2411_p2 = scmp.eq.s32.totalorder %s1557_s18, 3  ;;  %p136_p3 = scmp.eq.s32.totalorder %s1558_s19, 3 }
   0xa   : > { %p2417_p4 = por %p2407_p1, %p52_p0  ;;  %p1559_p5 = scmp.ge.s32.totalorder %s2341_s17, 1 }
   0xb   : > { %p2422_p6 = por %p136_p3, %p52_p0  ;;  %p143_p7 = scmp.lt.s32.totalorder %s2341_s17, 5 }
   0xc   : > { %s2343_s25 = smov [#allocation5]   ;;  %s32_s28 = sadd.s32 1, %s2337_s16 }
   0xd   : > { %s2763_s23 = scalar_select %p2422_p6, 1, 0 }
   0xe   : > { %p2427_p8 = pnand %p1559_p5, %p143_p7  ;;  %s157_s26 = sshll.u32 %s2343_s25, 4  ;;  %s158_s26 = int_to_ptr.vmem [resolvable:$true] %s157_s26 }
   0xf   : > { %s2214_s29 = scalar_lea.vmem %s158_s26, 2048  ;;  %p2222_p3 = scmp.lt.s32.totalorder %s158_s26, %s158_s26 }
  0x10   : > { %p2019_p9 = pneg %p2427_p8  ;;  %p2215_p12 = scmp.ne.s32.totalorder %s158_s26, %s2214_s29 }
  0x11   : > { %p2223_p5 = scmp.lt.s32.totalorder %s2214_s29, %s2214_s29 }
  0x12   : > { %p2435_p10 = pnand %p2019_p9, %p2407_p1 }
  0x13   : > { %p2224_p7 = por %p2223_p5, %p2222_p3 }
  0x14   : > { %p2205_p11 = pneg %p2435_p10 }
  0x16   : > { %p2217_p13 = pnand %p2215_p12, %p2205_p11 }
  0x18   : > { %p2218_p0 = pneg %p2217_p13 }
  0x1a   : > { %p2225_p6 = pnand %p2224_p7, %p2218_p0 }
  0x1c   : > { %2228 = shalt.err (!%p2225_p6)
}
  0x1d   : > { %s2344_s30 = smov 64   ;;  %s2345_s4 = smov 4  }
  0x1e   : > { %2022 = dma.hbm_to_vmem [thread:$0]  (!%p2435_p10), %s2756_s1, 2048, %s158_s26, [#allocation6], %s2344_s30, %s2344_s30, %s2345_s4  }
  0x1f   : > { %p34_p9 = scmp.ge.s32.totalorder %s32_s28, 4  ;;  %s39_s7 = sadd.s32 1, %s2329_s14 }
  0x20   : > { %p46_p6 = scmp.ne.s32.totalorder %s2329_s14, %s2325_s13  ;;  %p47_p11 = scmp.eq.s32.totalorder %s2341_s17, 0 }
  0x21   : > { %s2777_s28 = smov (%p34_p9, %s32_s28), 0  ;;  %p2032_p0 = scmp.lt.s32.totalorder %s2341_s17, 4 }
  0x22   : > { %p2453_p12 = por %p47_p11, %p46_p6  ;;  %p2459_p13 = por %p2411_p2, %p46_p6 }
  0x23   : > { %s36_s10 = ssub.s32 %s2337_s16, %s2777_s28  ;;  %s177_s11 = sand.u32 1, %s2329_s14  }
  0x24   : > { %s2767_s9 = scalar_select %p2459_p13, 1, 0 }
  0x25   : > { %p37_p10 = scmp.eq.s32.totalorder %s36_s10, 0  ;;  %s1563_s18 = sshll.u32 %s177_s11, 9 }
  0x26   : > { %s1722_s25 = sshll.u32 %s2337_s16, 13  ;;  %s181_s30 = scalar_lea.vmem [#allocation2], %s1563_s18 }
  0x27   : > { %s2468_s19 = scalar_select %p37_p10, %s2329_s14, %s39_s7  }
  0x28   : > { %s188_s29 = scalar_lea.hbm %s2755_s0, %s1722_s25  ;;  %s189_s4 = sshll.u32 %s181_s30, 4  ;;  %s190_s4 = int_to_ptr.vmem [resolvable:$true] %s189_s4 }
  0x29   : > { %p2476_p2 = pnand %p2032_p0, %p2453_p12  ;;  %s178_s5 = scalar_lea.sflag [#allocation3], %s177_s11 }
  0x2a   : > { %s2242_s6 = scalar_lea.vmem %s190_s4, 8192  ;;  %s2346_s7 = smov [#allocation2]  }
  0x2b   : > { %p2231_p3 = pneg %p2476_p2  ;;  %p2243_p5 = scmp.ne.s32.totalorder %s190_s4, %s2242_s6 }
  0x2c   : > { %s2247_s10 = sshll.u32 %s2346_s7, 4  ;;  %s2248_s10 = int_to_ptr.vmem [resolvable:$false] %s2247_s10 }
  0x2d   : > { %p2245_p7 = pnand %p2243_p5, %p2231_p3  ;;  %s2249_s25 = scalar_lea.vmem %s2248_s10, 16384 }
  0x2e   : > { %p2250_p6 = scmp.lt.s32.totalorder %s190_s4, %s2248_s10  ;;  %p2251_p11 = scmp.lt.s32.totalorder %s2249_s25, %s2242_s6 }
  0x2f   : > { %p2246_p9 = pneg %p2245_p7 }
  0x30   : > { %p2252_p10 = por %p2251_p11, %p2250_p6 }
  0x32   : > { %p2253_p13 = pnand %p2252_p10, %p2246_p9 }
  0x34   : > { %2256 = shalt.err (!%p2253_p13)
}
  0x35   : > { %s2347_s8 = smov 128   ;;  %s2348_s18 = smov 8  }
  0x36   : > { %2026 = dma.hbm_to_vmem [thread:$0]  (!%p2476_p2), %s188_s29, 8192, %s190_s4, %s178_s5, %s2347_s8, %s2347_s8, %s2348_s18  }
  0x37   : > { %201 = sbr.rel (%p2427_p8) target bundleno = 465 (0x1d1), region = 32  ;;  %s2487_s11 = sand.u32 (!%p2427_p8), 1, %s2325_s13  }
  0x38   : > { %s1568_s26 = sshll.u32 (!%p2427_p8), %s2487_s11, 9  ;;  %s204_s27 = scalar_lea.sflag (!%p2427_p8), [#allocation3], %s2487_s11 }
  0x39   : > { %s2491_s30 = scalar_lea.vmem (!%p2427_p8), [#allocation2], %s1568_s26 }
  0x3c   : > { %2308 = dma.done.wait (%p2417_p4), %s204_s27, 8192  }
  0x3d   : > { %2310 = vsyncadd (%p2417_p4), %s204_s27, 4294959104 }
  0x3e   : > { %2312 = dma.done.wait (%p2407_p1), [#allocation6], 2048  }
  0x3f   : > { %2314 = vsyncadd (%p2407_p1), [#allocation6], 4294965248  ;;  %v2349_v0 = vmov 0   ;;  %v2091_v1 = vld [vmem:[#allocation5 + $0x38] sm:$0xff]   ;;  %v2092_v2 = vld [vmem:[#allocation5 + $0x30] sm:$0xff]   ;;  %s1570_s24 = sshll.u32 %s2487_s11, 8 }
  0x40   : > { %762 = vmatprep.subr.bf16.mxu0 %v2349_v0  ;;  %1979 = vmatprep.subr.bf16.mxu1 %v2349_v0  ;;  %v2093_v3 = vld [vmem:[#allocation5 + $0x28] sm:$0xff]   ;;  %v2094_v4 = vld [vmem:[#allocation5 + $0x20] sm:$0xff]   ;;  %v2095_v5 = vld [vmem:[#allocation5 + $0x18] sm:$0xff]   ;;  %s2607_s29 = scalar_lea.vmem [#allocation7], %s1570_s24  ;;  %s1787_s4 = sshll.u32 %s2333_s15, 12 }
  0x41   : > { %763 = vmatpush1.bf16.msra.mxu0 %v2091_v1  ;;  %1995 = vmatpush1.bf16.msra.mxu1 %v2091_v1  ;;  %v2109_v6 = vld [vmem:[%s2491_s30 + $0x4] ss:$8 sps:$4 sm:$0xff]   ;;  %v2096_v7 = vld [vmem:[#allocation5 + $0x10] sm:$0xff]   ;;  %v2099_v11 = vld [vmem:[#allocation5 + $0x78] sm:$0xff]   ;;  %s1450_s21 = sshll.u32 %s2607_s29, 4  ;;  %s2704_s7 = scalar_lea.hbm %s2758_s3, %s1787_s4  ;;  %s2706_s21 = int_to_ptr.vmem [resolvable:$true] %s1450_s21 }
  0x42   : > { %764 = vmatprep.subr.bf16.mxu0 %v2349_v0  ;;  %1980 = vmatprep.subr.bf16.mxu1 %v2349_v0  ;;  %v2112_v8 = vld [vmem:[%s2491_s30 + $0x104] ss:$8 sps:$4 sm:$0xff]   ;;  %v2100_v12 = vld [vmem:[#allocation5 + $0x70] sm:$0xff]   ;;  %v2103_v15 = vld [vmem:[#allocation5 + $0x58] sm:$0xff]   ;;  %s1436_s15 = scalar_lea.sflag [#allocation4], %s2487_s11  ;;  %s2257_s10 = scalar_lea.vmem %s2706_s21, 4096 }
  0x43   : > { %794 = vmatprep.mubr.bf16.mxu0 %v2109_v6  ;;  %922 = vmatprep.mubr.bf16.mxu1 %v2112_v8  ;;  %v2097_v9 = vld [vmem:[#allocation5 + $0x8] sm:$0xff]   ;;  %v2098_v10 = vld [vmem:[#allocation5] sm:$0xff]   ;;  %v2104_v16 = vld [vmem:[#allocation5 + $0x50] sm:$0xff]   ;;  %p2258_p1 = scmp.ne.s32.totalorder %s2706_s21, %s2257_s10  ;;  %p2769_p4 = scmp.ne.s32.totalorder %s2767_s9, 0 }
  0x44   : > { %v2101_v13 = vld [vmem:[#allocation5 + $0x68] sm:$0xff]   ;;  %v2102_v14 = vld [vmem:[#allocation5 + $0x60] sm:$0xff]   ;;  %v2113_v21 = vld [vmem:[%s2491_s30 + $0x14] ss:$8 sps:$4 sm:$0xff]   ;;  %s2350_s25 = smov [#allocation7]  }
  0x45   : > { %765 = vmatpush1.bf16.msra.mxu0 %v2092_v2  ;;  %1996 = vmatpush1.bf16.msra.mxu1 %v2092_v2  ;;  %v2105_v17 = vld [vmem:[#allocation5 + $0x48] sm:$0xff]   ;;  %v2106_v18 = vld [vmem:[#allocation5 + $0x40] sm:$0xff]   ;;  %v2115_v22 = vld [vmem:[%s2491_s30 + $0x114] ss:$8 sps:$4 sm:$0xff]   ;;  %p2259_p8 = pnand %p2258_p1, %p2769_p4  ;;  %s2261_s8 = sshll.u32 %s2350_s25, 4  ;;  %s2262_s8 = int_to_ptr.vmem [resolvable:$false] %s2261_s8 }
  0x46   : > { %766 = vmatprep.subr.bf16.mxu0 %v2349_v0  ;;  %1981 = vmatprep.subr.bf16.mxu1 %v2349_v0  ;;  %v2107_v19 = vld [vmem:[%s2491_s30] ss:$8 sps:$4 sm:$0xff]   ;;  %v2117_v23 = vld [vmem:[%s2491_s30 + $0x10] ss:$8 sps:$4 sm:$0xff]   ;;  %v2119_v25 = vld [vmem:[%s2491_s30 + $0x24] ss:$8 sps:$4 sm:$0xff]   ;;  %p2264_p13 = scmp.lt.s32.totalorder %s2706_s21, %s2262_s8 }
  0x47   : > { %v2110_v20 = vld [vmem:[%s2491_s30 + $0x100] ss:$8 sps:$4 sm:$0xff]   ;;  %v2118_v24 = vld [vmem:[%s2491_s30 + $0x110] ss:$8 sps:$4 sm:$0xff]   ;;  %v2121_v26 = vld [vmem:[%s2491_s30 + $0x124] ss:$8 sps:$4 sm:$0xff]   ;;  %p2260_p12 = pneg %p2259_p8 }
  0x48   : > { %v2123_v27 = vld [vmem:[%s2491_s30 + $0x20] ss:$8 sps:$4 sm:$0xff]   ;;  %v2125_v29 = vld [vmem:[%s2491_s30 + $0x34] ss:$8 sps:$4 sm:$0xff]   ;;  %v2129_v31 = vld [vmem:[%s2491_s30 + $0x30] ss:$8 sps:$4 sm:$0xff]  }
  0x49   : > { %767 = vmatpush1.bf16.msra.mxu0 %v2093_v3  ;;  %1997 = vmatpush1.bf16.msra.mxu1 %v2093_v3  ;;  %v2124_v28 = vld [vmem:[%s2491_s30 + $0x120] ss:$8 sps:$4 sm:$0xff]   ;;  %v2127_v30 = vld [vmem:[%s2491_s30 + $0x134] ss:$8 sps:$4 sm:$0xff]   ;;  %v2130_v32 = vld [vmem:[%s2491_s30 + $0x130] ss:$8 sps:$4 sm:$0xff]  }
  0x4a   : > { %768 = vmatprep.subr.bf16.mxu0 %v2349_v0  ;;  %1982 = vmatprep.subr.bf16.mxu1 %v2349_v0  ;;  %v2131_v33 = vld [vmem:[%s2491_s30 + $0x44] ss:$8 sps:$4 sm:$0xff]   ;;  %v2135_v35 = vld [vmem:[%s2491_s30 + $0x40] ss:$8 sps:$4 sm:$0xff]   ;;  %v2137_v37 = vld [vmem:[%s2491_s30 + $0x54] ss:$8 sps:$4 sm:$0xff]  }
  0x4b   : > { %v2133_v34 = vld [vmem:[%s2491_s30 + $0x144] ss:$8 sps:$4 sm:$0xff]   ;;  %v2136_v36 = vld [vmem:[%s2491_s30 + $0x140] ss:$8 sps:$4 sm:$0xff]   ;;  %v2139_v38 = vld [vmem:[%s2491_s30 + $0x154] ss:$8 sps:$4 sm:$0xff]  }
  0x4c   : > { %v2141_v39 = vld [vmem:[%s2491_s30 + $0x50] ss:$8 sps:$4 sm:$0xff]   ;;  %v2143_v41 = vld [vmem:[%s2491_s30 + $0x64] ss:$8 sps:$4 sm:$0xff]   ;;  %v2147_v43 = vld [vmem:[%s2491_s30 + $0x60] ss:$8 sps:$4 sm:$0xff]  }
  0x4d   : > { %769 = vmatpush1.bf16.msra.mxu0 %v2094_v4  ;;  %1998 = vmatpush1.bf16.msra.mxu1 %v2094_v4  ;;  %v2142_v40 = vld [vmem:[%s2491_s30 + $0x150] ss:$8 sps:$4 sm:$0xff]   ;;  %v2145_v42 = vld [vmem:[%s2491_s30 + $0x164] ss:$8 sps:$4 sm:$0xff]   ;;  %v2148_v44 = vld [vmem:[%s2491_s30 + $0x160] ss:$8 sps:$4 sm:$0xff]  }
  0x4e   : > { %770 = vmatprep.subr.bf16.mxu0 %v2349_v0  ;;  %1983 = vmatprep.subr.bf16.mxu1 %v2349_v0  ;;  %v2149_v45 = vld [vmem:[%s2491_s30 + $0x74] ss:$8 sps:$4 sm:$0xff]   ;;  %v2153_v47 = vld [vmem:[%s2491_s30 + $0x70] ss:$8 sps:$4 sm:$0xff]   ;;  %v2155_v49 = vld [vmem:[%s2491_s30 + $0x84] ss:$8 sps:$4 sm:$0xff]  }
  0x4f   : > { %v2151_v46 = vld [vmem:[%s2491_s30 + $0x174] ss:$8 sps:$4 sm:$0xff]   ;;  %v2154_v48 = vld [vmem:[%s2491_s30 + $0x170] ss:$8 sps:$4 sm:$0xff]   ;;  %v2157_v50 = vld [vmem:[%s2491_s30 + $0x184] ss:$8 sps:$4 sm:$0xff]  }
  0x50   : > { %v2159_v51 = vld [vmem:[%s2491_s30 + $0x80] ss:$8 sps:$4 sm:$0xff]   ;;  %v2161_v53 = vld [vmem:[%s2491_s30 + $0x94] ss:$8 sps:$4 sm:$0xff]   ;;  %v2165_v55 = vld [vmem:[%s2491_s30 + $0x90] ss:$8 sps:$4 sm:$0xff]  }
  0x51   : > { %771 = vmatpush1.bf16.msra.mxu0 %v2095_v5  ;;  %1999 = vmatpush1.bf16.msra.mxu1 %v2095_v5  ;;  %v2160_v52 = vld [vmem:[%s2491_s30 + $0x180] ss:$8 sps:$4 sm:$0xff]   ;;  %v2163_v54 = vld [vmem:[%s2491_s30 + $0x194] ss:$8 sps:$4 sm:$0xff]   ;;  %v2166_v56 = vld [vmem:[%s2491_s30 + $0x190] ss:$8 sps:$4 sm:$0xff]  }
  0x52   : > { %772 = vmatprep.subr.bf16.mxu0 %v2349_v0  ;;  %1984 = vmatprep.subr.bf16.mxu1 %v2349_v0  ;;  %v2167_v57 = vld [vmem:[%s2491_s30 + $0xa4] ss:$8 sps:$4 sm:$0xff]   ;;  %v2171_v59 = vld [vmem:[%s2491_s30 + $0xa0] ss:$8 sps:$4 sm:$0xff]   ;;  %v2173_v61 = vld [vmem:[%s2491_s30 + $0xb4] ss:$8 sps:$4 sm:$0xff]  }
  0x53   : > { %v2169_v58 = vld [vmem:[%s2491_s30 + $0x1a4] ss:$8 sps:$4 sm:$0xff]   ;;  %v2172_v60 = vld [vmem:[%s2491_s30 + $0x1a0] ss:$8 sps:$4 sm:$0xff]   ;;  %v2175_v62 = vld [vmem:[%s2491_s30 + $0x1b4] ss:$8 sps:$4 sm:$0xff]  }
  0x54   : > { %v2177_v63 = vld [vmem:[%s2491_s30 + $0xb0] ss:$8 sps:$4 sm:$0xff]   ;;  %v2179_v1 = vld [vmem:[%s2491_s30 + $0xc4] ss:$8 sps:$4 sm:$0xff]   ;;  %v2183_v3 = vld [vmem:[%s2491_s30 + $0xc0] ss:$8 sps:$4 sm:$0xff]  }
  0x55   : > { %773 = vmatpush1.bf16.msra.mxu0 %v2096_v7  ;;  %2000 = vmatpush1.bf16.msra.mxu1 %v2096_v7  ;;  %v2181_v2 = vld [vmem:[%s2491_s30 + $0x1c4] ss:$8 sps:$4 sm:$0xff]   ;;  %v2184_v4 = vld [vmem:[%s2491_s30 + $0x1c0] ss:$8 sps:$4 sm:$0xff]   ;;  %v2185_v5 = vld [vmem:[%s2491_s30 + $0xd4] ss:$8 sps:$4 sm:$0xff]  }
  0x56   : > { %774 = vmatprep.subr.bf16.mxu0 %v2349_v0  ;;  %1985 = vmatprep.subr.bf16.mxu1 %v2349_v0  ;;  %v2187_v6 = vld [vmem:[%s2491_s30 + $0x1d4] ss:$8 sps:$4 sm:$0xff]   ;;  %v2189_v7 = vld [vmem:[%s2491_s30 + $0xd0] ss:$8 sps:$4 sm:$0xff]   ;;  %s2263_s18 = scalar_lea.vmem %s2262_s8, 8192 }
  0x57   : > { %v2190_v8 = vld [vmem:[%s2491_s30 + $0x1d0] ss:$8 sps:$4 sm:$0xff]   ;;  %p2265_p0 = scmp.lt.s32.totalorder %s2263_s18, %s2257_s10 }
  0x59   : > { %775 = vmatpush1.bf16.msra.mxu0 %v2097_v9  ;;  %2001 = vmatpush1.bf16.msra.mxu1 %v2097_v9  ;;  %v2191_v9 = vld [vmem:[%s2491_s30 + $0xe4] ss:$8 sps:$4 sm:$0xff]   ;;  %p2266_p2 = por %p2265_p0, %p2264_p13 }
  0x5a   : > { %776 = vmatprep.subr.bf16.mxu0 %v2349_v0  ;;  %1986 = vmatprep.subr.bf16.mxu1 %v2349_v0 }
  0x5b   : > { %p2267_p3 = pnand %p2266_p2, %p2260_p12 }
  0x5d   : > { %777 = vmatpush1.bf16.msra.mxu0 %v2098_v10  ;;  %2002 = vmatpush1.bf16.msra.mxu1 %v2098_v10  ;;  %v2193_v10 = vld [vmem:[%s2491_s30 + $0x1e4] ss:$8 sps:$4 sm:$0xff]  }
  0x5e   : > { %778 = vmatprep.subr.bf16.mxu0 %v2349_v0  ;;  %1987 = vmatprep.subr.bf16.mxu1 %v2349_v0 }
  0x61   : > { %779 = vmatpush2.bf16.msra.mxu0 %v2099_v11  ;;  %2003 = vmatpush2.bf16.msra.mxu1 %v2099_v11  ;;  %v2195_v11 = vld [vmem:[%s2491_s30 + $0xe0] ss:$8 sps:$4 sm:$0xff]  }
  0x62   : > { %780 = vmatprep.subr.bf16.mxu0 %v2349_v0  ;;  %1988 = vmatprep.subr.bf16.mxu1 %v2349_v0 }
  0x65   : > { %781 = vmatpush2.bf16.msra.mxu0 %v2100_v12  ;;  %2004 = vmatpush2.bf16.msra.mxu1 %v2100_v12  ;;  %v2196_v12 = vld [vmem:[%s2491_s30 + $0x1e0] ss:$8 sps:$4 sm:$0xff]  }
  0x66   : > { %782 = vmatprep.subr.bf16.mxu0 %v2349_v0  ;;  %1989 = vmatprep.subr.bf16.mxu1 %v2349_v0 }
  0x69   : > { %783 = vmatpush2.bf16.msra.mxu0 %v2101_v13  ;;  %2005 = vmatpush2.bf16.msra.mxu1 %v2101_v13  ;;  %v2197_v13 = vld [vmem:[%s2491_s30 + $0xf4] ss:$8 sps:$4 sm:$0xff]  }
  0x6a   : > { %784 = vmatprep.subr.bf16.mxu0 %v2349_v0  ;;  %1990 = vmatprep.subr.bf16.mxu1 %v2349_v0 }
  0x6d   : > { %785 = vmatpush2.bf16.msra.mxu0 %v2102_v14  ;;  %2006 = vmatpush2.bf16.msra.mxu1 %v2102_v14  ;;  %v2199_v14 = vld [vmem:[%s2491_s30 + $0x1f4] ss:$8 sps:$4 sm:$0xff]  }
  0x6e   : > { %786 = vmatprep.subr.bf16.mxu0 %v2349_v0  ;;  %1991 = vmatprep.subr.bf16.mxu1 %v2349_v0 }
  0x71   : > { %787 = vmatpush2.bf16.msra.mxu0 %v2103_v15  ;;  %2007 = vmatpush2.bf16.msra.mxu1 %v2103_v15  ;;  %v2201_v15 = vld [vmem:[%s2491_s30 + $0xf0] ss:$8 sps:$4 sm:$0xff]  }
  0x72   : > { %788 = vmatprep.subr.bf16.mxu0 %v2349_v0  ;;  %1992 = vmatprep.subr.bf16.mxu1 %v2349_v0 }
  0x75   : > { %789 = vmatpush2.bf16.msra.mxu0 %v2104_v16  ;;  %2008 = vmatpush2.bf16.msra.mxu1 %v2104_v16  ;;  %v2202_v16 = vld [vmem:[%s2491_s30 + $0x1f0] ss:$8 sps:$4 sm:$0xff]  }
  0x76   : > { %790 = vmatprep.subr.bf16.mxu0 %v2349_v0  ;;  %1993 = vmatprep.subr.bf16.mxu1 %v2349_v0 }
  0x79   : > { %791 = vmatpush2.bf16.msra.mxu0 %v2105_v17  ;;  %2009 = vmatpush2.bf16.msra.mxu1 %v2105_v17  ;;  %v2600_v17 = vld [vmem:[%s2757_s2] ss:$0 sm:$0xff] }
  0x7a   : > { %792 = vmatprep.subr.bf16.mxu0 %v2349_v0  ;;  %1994 = vmatprep.subr.bf16.mxu1 %v2349_v0  ;;  %v2178_v0 = vld [vmem:[%s2491_s30 + $0x1b0] ss:$8 sps:$4 sm:$0xff]  }
  0x7d   : > { %793 = vmatpush2.bf16.msra.mxu0 %v2106_v18  ;;  %2010 = vmatpush2.bf16.msra.mxu1 %v2106_v18 }
  0x80   : > { %795 = vmatmul.mubr.bf16.vlgmr.msra.gmra.mxu0 %v2107_v19  ;;  %923 = vmatmul.mubr.bf16.vlgmr.msra.gmra.mxu1 %v2110_v20 }
  0x81   : > { %802 = vmatprep.mubr.bf16.mxu0 %v2113_v21  ;;  %930 = vmatprep.mubr.bf16.mxu1 %v2115_v22 }
  0x88   : > { %803 = vmatmul.mubr.bf16.gmra.mxu0 %v2117_v23  ;;  %931 = vmatmul.mubr.bf16.gmra.mxu1 %v2118_v24 }
  0x89   : > { %810 = vmatprep.mubr.bf16.mxu0 %v2119_v25  ;;  %938 = vmatprep.mubr.bf16.mxu1 %v2121_v26 }
  0x90   : > { %811 = vmatmul.mubr.bf16.gmra.mxu0 %v2123_v27  ;;  %939 = vmatmul.mubr.bf16.gmra.mxu1 %v2124_v28 }
  0x91   : > { %818 = vmatprep.mubr.bf16.mxu0 %v2125_v29  ;;  %946 = vmatprep.mubr.bf16.mxu1 %v2127_v30 }
  0x98   : > { %819 = vmatmul.mubr.bf16.gmra.mxu0 %v2129_v31  ;;  %947 = vmatmul.mubr.bf16.gmra.mxu1 %v2130_v32 }
  0x99   : > { %826 = vmatprep.mubr.bf16.mxu0 %v2131_v33  ;;  %954 = vmatprep.mubr.bf16.mxu1 %v2133_v34 }
  0xa0   : > { %827 = vmatmul.mubr.bf16.gmra.mxu0 %v2135_v35  ;;  %955 = vmatmul.mubr.bf16.gmra.mxu1 %v2136_v36 }
  0xa1   : > { %834 = vmatprep.mubr.bf16.mxu0 %v2137_v37  ;;  %962 = vmatprep.mubr.bf16.mxu1 %v2139_v38 }
  0xa8   : > { %835 = vmatmul.mubr.bf16.gmra.mxu0 %v2141_v39  ;;  %963 = vmatmul.mubr.bf16.gmra.mxu1 %v2142_v40 }
  0xa9   : > { %842 = vmatprep.mubr.bf16.mxu0 %v2143_v41  ;;  %970 = vmatprep.mubr.bf16.mxu1 %v2145_v42 }
  0xb0   : > { %843 = vmatmul.mubr.bf16.gmra.mxu0 %v2147_v43  ;;  %971 = vmatmul.mubr.bf16.gmra.mxu1 %v2148_v44 }
  0xb1   : > { %850 = vmatprep.mubr.bf16.mxu0 %v2149_v45  ;;  %978 = vmatprep.mubr.bf16.mxu1 %v2151_v46 }
  0xb8   : > { %851 = vmatmul.mubr.bf16.gmra.mxu0 %v2153_v47  ;;  %979 = vmatmul.mubr.bf16.gmra.mxu1 %v2154_v48 }
  0xb9   : > { %858 = vmatprep.mubr.bf16.mxu0 %v2155_v49  ;;  %986 = vmatprep.mubr.bf16.mxu1 %v2157_v50 }
  0xc0   : > { %859 = vmatmul.mubr.bf16.gmra.mxu0 %v2159_v51  ;;  %987 = vmatmul.mubr.bf16.gmra.mxu1 %v2160_v52 }
  0xc1   : > { %866 = vmatprep.mubr.bf16.mxu0 %v2161_v53  ;;  %994 = vmatprep.mubr.bf16.mxu1 %v2163_v54 }
  0xc8   : > { %867 = vmatmul.mubr.bf16.gmra.mxu0 %v2165_v55  ;;  %995 = vmatmul.mubr.bf16.gmra.mxu1 %v2166_v56 }
  0xc9   : > { %874 = vmatprep.mubr.bf16.mxu0 %v2167_v57  ;;  %1002 = vmatprep.mubr.bf16.mxu1 %v2169_v58 }
  0xd0   : > { %875 = vmatmul.mubr.bf16.gmra.mxu0 %v2171_v59  ;;  %1003 = vmatmul.mubr.bf16.gmra.mxu1 %v2172_v60 }
  0xd1   : > { %882 = vmatprep.mubr.bf16.mxu0 %v2173_v61  ;;  %1010 = vmatprep.mubr.bf16.mxu1 %v2175_v62 }
  0xd8   : > { %883 = vmatmul.mubr.bf16.gmra.mxu0 %v2177_v63  ;;  %1011 = vmatmul.mubr.bf16.gmra.mxu1 %v2178_v0 }
  0xd9   : > { %890 = vmatprep.mubr.bf16.mxu0 %v2179_v1  ;;  %1018 = vmatprep.mubr.bf16.mxu1 %v2181_v2 }
  0xe0   : > { %891 = vmatmul.mubr.bf16.gmra.mxu0 %v2183_v3  ;;  %1019 = vmatmul.mubr.bf16.gmra.mxu1 %v2184_v4 }
  0xe1   : > { %898 = vmatprep.mubr.bf16.mxu0 %v2185_v5  ;;  %1026 = vmatprep.mubr.bf16.mxu1 %v2187_v6 }
  0xe8   : > { %899 = vmatmul.mubr.bf16.gmra.mxu0 %v2189_v7  ;;  %1027 = vmatmul.mubr.bf16.gmra.mxu1 %v2190_v8 }
  0xe9   : > { %906 = vmatprep.mubr.bf16.mxu0 %v2191_v9  ;;  %1034 = vmatprep.mubr.bf16.mxu1 %v2193_v10 }
  0xf0   : > { %907 = vmatmul.mubr.bf16.gmra.mxu0 %v2195_v11  ;;  %1035 = vmatmul.mubr.bf16.gmra.mxu1 %v2196_v12 }
  0xf1   : > { %914 = vmatprep.mubr.bf16.mxu0 %v2197_v13  ;;  %1042 = vmatprep.mubr.bf16.mxu1 %v2199_v14 }
  0xf8   : > { %915 = vmatmul.mubr.bf16.gmra.mxu0 %v2201_v15  ;;  %1043 = vmatmul.mubr.bf16.gmra.mxu1 %v2202_v16 }
 0x140   : > { %v796_v18 = vpop.f32.mrf.mxu0  ;;  %v924_v19 = vpop.f32.mrf.mxu1 }
 0x141   : > { %v797_v22 = vadd.f32 %v2600_v17, %v796_v18  ;;  %v925_v23 = vadd.f32 %v2600_v17, %v924_v19 }
 0x142   : > { %v798_v20 = vpop.f32.mrf.mxu0  ;;  %v926_v21 = vpop.f32.mrf.mxu1 }
 0x143   : > { %v1051_v30 = vmax.f32 %v797_v22, 0.0  ;;  %v1083_v31 = vmax.f32 %v925_v23, 0.0 }
 0x144   : > { %v799_v24 = vpop.f32.mrf.mxu0  ;;  %v927_v25 = vpop.f32.mrf.mxu1 }
 0x145   : > { %v800_v26 = vadd.f32 %v2600_v17, %v799_v24  ;;  %v928_v27 = vadd.f32 %v2600_v17, %v927_v25 }
 0x146   : > { %v801_v28 = vpop.f32.mrf.mxu0  ;;  %v929_v29 = vpop.f32.mrf.mxu1 }
 0x147   : > { %v1052_v32 = vmax.f32 %v800_v26, 0.0  ;;  %v1084_v33 = vmax.f32 %v928_v27, 0.0 }
 0x148   : > { %v804_v34 = vpop.f32.mrf.mxu0  ;;  %v932_v35 = vpop.f32.mrf.mxu1 }
 0x149   : > { %v1791_v36 = vpack.c.bf16 %v1052_v32, %v1051_v30  ;;  %v1871_v37 = vpack.c.bf16 %v1084_v33, %v1083_v31  ;;  %v805_v40 = vadd.f32 %v2600_v17, %v804_v34  ;;  %v933_v41 = vadd.f32 %v2600_v17, %v932_v35 }
 0x14a   : > { %v806_v38 = vpop.f32.mrf.mxu0  ;;  %v934_v39 = vpop.f32.mrf.mxu1 }
 0x14b   : > { %1792 = vst [vmem:[%s2607_s29] sm:$0xff] %v1791_v36   ;;  %1963 = vst [vmem:[%s2607_s29 + $0x80] sm:$0xff] %v1871_v37   ;;  %v1053_v48 = vmax.f32 %v805_v40, 0.0  ;;  %v1085_v49 = vmax.f32 %v933_v41, 0.0 }
 0x14c   : > { %v807_v42 = vpop.f32.mrf.mxu0  ;;  %v935_v43 = vpop.f32.mrf.mxu1 }
 0x14d   : > { %v808_v44 = vadd.f32 %v2600_v17, %v807_v42  ;;  %v936_v45 = vadd.f32 %v2600_v17, %v935_v43 }
 0x14e   : > { %v809_v46 = vpop.f32.mrf.mxu0  ;;  %v937_v47 = vpop.f32.mrf.mxu1 }
 0x14f   : > { %v1054_v50 = vmax.f32 %v808_v44, 0.0  ;;  %v1086_v51 = vmax.f32 %v936_v45, 0.0 }
 0x150   : > { %v812_v52 = vpop.f32.mrf.mxu0  ;;  %v940_v53 = vpop.f32.mrf.mxu1 }
 0x151   : > { %v1796_v54 = vpack.c.bf16 %v1054_v50, %v1053_v48  ;;  %v1876_v55 = vpack.c.bf16 %v1086_v51, %v1085_v49  ;;  %v813_v58 = vadd.f32 %v2600_v17, %v812_v52  ;;  %v941_v59 = vadd.f32 %v2600_v17, %v940_v53 }
 0x152   : > { %v814_v56 = vpop.f32.mrf.mxu0  ;;  %v942_v57 = vpop.f32.mrf.mxu1 }
 0x153   : > { %1948 = vst [vmem:[%s2607_s29 + $0x8] sm:$0xff] %v1796_v54   ;;  %1964 = vst [vmem:[%s2607_s29 + $0x88] sm:$0xff] %v1876_v55   ;;  %v1055_v2 = vmax.f32 %v813_v58, 0.0  ;;  %v1087_v3 = vmax.f32 %v941_v59, 0.0 }
 0x154   : > { %v815_v60 = vpop.f32.mrf.mxu0  ;;  %v943_v61 = vpop.f32.mrf.mxu1 }
 0x155   : > { %v816_v62 = vadd.f32 %v2600_v17, %v815_v60  ;;  %v944_v63 = vadd.f32 %v2600_v17, %v943_v61 }
 0x156   : > { %v817_v0 = vpop.f32.mrf.mxu0  ;;  %v945_v1 = vpop.f32.mrf.mxu1 }
 0x157   : > { %v1056_v4 = vmax.f32 %v816_v62, 0.0  ;;  %v1088_v5 = vmax.f32 %v944_v63, 0.0 }
 0x158   : > { %v820_v6 = vpop.f32.mrf.mxu0  ;;  %v948_v7 = vpop.f32.mrf.mxu1 }
 0x159   : > { %v1801_v8 = vpack.c.bf16 %v1056_v4, %v1055_v2  ;;  %v1881_v9 = vpack.c.bf16 %v1088_v5, %v1087_v3  ;;  %v821_v12 = vadd.f32 %v2600_v17, %v820_v6  ;;  %v949_v13 = vadd.f32 %v2600_v17, %v948_v7 }
 0x15a   : > { %v822_v10 = vpop.f32.mrf.mxu0  ;;  %v950_v11 = vpop.f32.mrf.mxu1 }
 0x15b   : > { %1949 = vst [vmem:[%s2607_s29 + $0x10] sm:$0xff] %v1801_v8   ;;  %1965 = vst [vmem:[%s2607_s29 + $0x90] sm:$0xff] %v1881_v9   ;;  %v1057_v21 = vmax.f32 %v821_v12, 0.0  ;;  %v1089_v22 = vmax.f32 %v949_v13, 0.0 }
 0x15c   : > { %v823_v14 = vpop.f32.mrf.mxu0  ;;  %v951_v15 = vpop.f32.mrf.mxu1 }
 0x15d   : > { %v824_v16 = vadd.f32 %v2600_v17, %v823_v14  ;;  %v952_v18 = vadd.f32 %v2600_v17, %v951_v15 }
 0x15e   : > { %v825_v19 = vpop.f32.mrf.mxu0  ;;  %v953_v20 = vpop.f32.mrf.mxu1 }
 0x15f   : > { %v1058_v23 = vmax.f32 %v824_v16, 0.0  ;;  %v1090_v24 = vmax.f32 %v952_v18, 0.0 }
 0x160   : > { %v828_v25 = vpop.f32.mrf.mxu0  ;;  %v956_v26 = vpop.f32.mrf.mxu1 }
 0x161   : > { %v1806_v27 = vpack.c.bf16 %v1058_v23, %v1057_v21  ;;  %v1886_v28 = vpack.c.bf16 %v1090_v24, %v1089_v22  ;;  %v829_v31 = vadd.f32 %v2600_v17, %v828_v25  ;;  %v957_v32 = vadd.f32 %v2600_v17, %v956_v26 }
 0x162   : > { %v830_v29 = vpop.f32.mrf.mxu0  ;;  %v958_v30 = vpop.f32.mrf.mxu1 }
 0x163   : > { %1950 = vst [vmem:[%s2607_s29 + $0x18] sm:$0xff] %v1806_v27   ;;  %1966 = vst [vmem:[%s2607_s29 + $0x98] sm:$0xff] %v1886_v28   ;;  %v1059_v39 = vmax.f32 %v829_v31, 0.0  ;;  %v1091_v40 = vmax.f32 %v957_v32, 0.0 }
 0x164   : > { %v831_v33 = vpop.f32.mrf.mxu0  ;;  %v959_v34 = vpop.f32.mrf.mxu1 }
 0x165   : > { %v832_v35 = vadd.f32 %v2600_v17, %v831_v33  ;;  %v960_v36 = vadd.f32 %v2600_v17, %v959_v34 }
 0x166   : > { %v833_v37 = vpop.f32.mrf.mxu0  ;;  %v961_v38 = vpop.f32.mrf.mxu1 }
 0x167   : > { %v1060_v41 = vmax.f32 %v832_v35, 0.0  ;;  %v1092_v42 = vmax.f32 %v960_v36, 0.0 }
 0x168   : > { %v836_v43 = vpop.f32.mrf.mxu0  ;;  %v964_v44 = vpop.f32.mrf.mxu1 }
 0x169   : > { %v1811_v45 = vpack.c.bf16 %v1060_v41, %v1059_v39  ;;  %v1891_v46 = vpack.c.bf16 %v1092_v42, %v1091_v40  ;;  %v837_v49 = vadd.f32 %v2600_v17, %v836_v43  ;;  %v965_v50 = vadd.f32 %v2600_v17, %v964_v44 }
 0x16a   : > { %v838_v47 = vpop.f32.mrf.mxu0  ;;  %v966_v48 = vpop.f32.mrf.mxu1 }
 0x16b   : > { %1951 = vst [vmem:[%s2607_s29 + $0x20] sm:$0xff] %v1811_v45   ;;  %1967 = vst [vmem:[%s2607_s29 + $0xa0] sm:$0xff] %v1891_v46   ;;  %v1061_v57 = vmax.f32 %v837_v49, 0.0  ;;  %v1093_v58 = vmax.f32 %v965_v50, 0.0 }
 0x16c   : > { %v839_v51 = vpop.f32.mrf.mxu0  ;;  %v967_v52 = vpop.f32.mrf.mxu1 }
 0x16d   : > { %v840_v53 = vadd.f32 %v2600_v17, %v839_v51  ;;  %v968_v54 = vadd.f32 %v2600_v17, %v967_v52 }
 0x16e   : > { %v841_v55 = vpop.f32.mrf.mxu0  ;;  %v969_v56 = vpop.f32.mrf.mxu1 }
 0x16f   : > { %v1062_v59 = vmax.f32 %v840_v53, 0.0  ;;  %v1094_v60 = vmax.f32 %v968_v54, 0.0 }
 0x170   : > { %v844_v61 = vpop.f32.mrf.mxu0  ;;  %v972_v62 = vpop.f32.mrf.mxu1 }
 0x171   : > { %v1816_v63 = vpack.c.bf16 %v1062_v59, %v1061_v57  ;;  %v1896_v0 = vpack.c.bf16 %v1094_v60, %v1093_v58  ;;  %v845_v3 = vadd.f32 %v2600_v17, %v844_v61  ;;  %v973_v4 = vadd.f32 %v2600_v17, %v972_v62 }
 0x172   : > { %v846_v1 = vpop.f32.mrf.mxu0  ;;  %v974_v2 = vpop.f32.mrf.mxu1 }
 0x173   : > { %1952 = vst [vmem:[%s2607_s29 + $0x28] sm:$0xff] %v1816_v63   ;;  %1968 = vst [vmem:[%s2607_s29 + $0xa8] sm:$0xff] %v1896_v0   ;;  %v1063_v11 = vmax.f32 %v845_v3, 0.0  ;;  %v1095_v12 = vmax.f32 %v973_v4, 0.0 }
 0x174   : > { %v847_v5 = vpop.f32.mrf.mxu0  ;;  %v975_v6 = vpop.f32.mrf.mxu1 }
 0x175   : > { %v848_v7 = vadd.f32 %v2600_v17, %v847_v5  ;;  %v976_v8 = vadd.f32 %v2600_v17, %v975_v6 }
 0x176   : > { %v849_v9 = vpop.f32.mrf.mxu0  ;;  %v977_v10 = vpop.f32.mrf.mxu1 }
 0x177   : > { %v1064_v13 = vmax.f32 %v848_v7, 0.0  ;;  %v1096_v14 = vmax.f32 %v976_v8, 0.0 }
 0x178   : > { %v852_v15 = vpop.f32.mrf.mxu0  ;;  %v980_v16 = vpop.f32.mrf.mxu1 }
 0x179   : > { %v1821_v18 = vpack.c.bf16 %v1064_v13, %v1063_v11  ;;  %v1901_v19 = vpack.c.bf16 %v1096_v14, %v1095_v12  ;;  %v853_v22 = vadd.f32 %v2600_v17, %v852_v15  ;;  %v981_v23 = vadd.f32 %v2600_v17, %v980_v16 }
 0x17a   : > { %v854_v20 = vpop.f32.mrf.mxu0  ;;  %v982_v21 = vpop.f32.mrf.mxu1 }
 0x17b   : > { %1953 = vst [vmem:[%s2607_s29 + $0x30] sm:$0xff] %v1821_v18   ;;  %1969 = vst [vmem:[%s2607_s29 + $0xb0] sm:$0xff] %v1901_v19   ;;  %v1065_v30 = vmax.f32 %v853_v22, 0.0  ;;  %v1097_v31 = vmax.f32 %v981_v23, 0.0 }
 0x17c   : > { %v855_v24 = vpop.f32.mrf.mxu0  ;;  %v983_v25 = vpop.f32.mrf.mxu1 }
 0x17d   : > { %v856_v26 = vadd.f32 %v2600_v17, %v855_v24  ;;  %v984_v27 = vadd.f32 %v2600_v17, %v983_v25 }
 0x17e   : > { %v857_v28 = vpop.f32.mrf.mxu0  ;;  %v985_v29 = vpop.f32.mrf.mxu1 }
 0x17f   : > { %v1066_v32 = vmax.f32 %v856_v26, 0.0  ;;  %v1098_v33 = vmax.f32 %v984_v27, 0.0 }
 0x180   : > { %v860_v34 = vpop.f32.mrf.mxu0  ;;  %v988_v35 = vpop.f32.mrf.mxu1 }
 0x181   : > { %v1826_v36 = vpack.c.bf16 %v1066_v32, %v1065_v30  ;;  %v1906_v37 = vpack.c.bf16 %v1098_v33, %v1097_v31  ;;  %v861_v40 = vadd.f32 %v2600_v17, %v860_v34  ;;  %v989_v41 = vadd.f32 %v2600_v17, %v988_v35 }
 0x182   : > { %v862_v38 = vpop.f32.mrf.mxu0  ;;  %v990_v39 = vpop.f32.mrf.mxu1 }
 0x183   : > { %1954 = vst [vmem:[%s2607_s29 + $0x38] sm:$0xff] %v1826_v36   ;;  %1970 = vst [vmem:[%s2607_s29 + $0xb8] sm:$0xff] %v1906_v37   ;;  %v1067_v48 = vmax.f32 %v861_v40, 0.0  ;;  %v1099_v49 = vmax.f32 %v989_v41, 0.0 }
 0x184   : > { %v863_v42 = vpop.f32.mrf.mxu0  ;;  %v991_v43 = vpop.f32.mrf.mxu1 }
 0x185   : > { %v864_v44 = vadd.f32 %v2600_v17, %v863_v42  ;;  %v992_v45 = vadd.f32 %v2600_v17, %v991_v43 }
 0x186   : > { %v865_v46 = vpop.f32.mrf.mxu0  ;;  %v993_v47 = vpop.f32.mrf.mxu1 }
 0x187   : > { %v1068_v50 = vmax.f32 %v864_v44, 0.0  ;;  %v1100_v51 = vmax.f32 %v992_v45, 0.0 }
 0x188   : > { %v868_v52 = vpop.f32.mrf.mxu0  ;;  %v996_v53 = vpop.f32.mrf.mxu1 }
 0x189   : > { %v1831_v54 = vpack.c.bf16 %v1068_v50, %v1067_v48  ;;  %v1911_v55 = vpack.c.bf16 %v1100_v51, %v1099_v49  ;;  %v869_v58 = vadd.f32 %v2600_v17, %v868_v52  ;;  %v997_v59 = vadd.f32 %v2600_v17, %v996_v53 }
 0x18a   : > { %v870_v56 = vpop.f32.mrf.mxu0  ;;  %v998_v57 = vpop.f32.mrf.mxu1 }
 0x18b   : > { %1955 = vst [vmem:[%s2607_s29 + $0x40] sm:$0xff] %v1831_v54   ;;  %1971 = vst [vmem:[%s2607_s29 + $0xc0] sm:$0xff] %v1911_v55   ;;  %v1069_v2 = vmax.f32 %v869_v58, 0.0  ;;  %v1101_v3 = vmax.f32 %v997_v59, 0.0 }
 0x18c   : > { %v871_v60 = vpop.f32.mrf.mxu0  ;;  %v999_v61 = vpop.f32.mrf.mxu1 }
 0x18d   : > { %v872_v62 = vadd.f32 %v2600_v17, %v871_v60  ;;  %v1000_v63 = vadd.f32 %v2600_v17, %v999_v61 }
 0x18e   : > { %v873_v0 = vpop.f32.mrf.mxu0  ;;  %v1001_v1 = vpop.f32.mrf.mxu1 }
 0x18f   : > { %v1070_v4 = vmax.f32 %v872_v62, 0.0  ;;  %v1102_v5 = vmax.f32 %v1000_v63, 0.0 }
 0x190   : > { %v876_v6 = vpop.f32.mrf.mxu0  ;;  %v1004_v7 = vpop.f32.mrf.mxu1 }
 0x191   : > { %v1836_v8 = vpack.c.bf16 %v1070_v4, %v1069_v2  ;;  %v1916_v9 = vpack.c.bf16 %v1102_v5, %v1101_v3  ;;  %v877_v12 = vadd.f32 %v2600_v17, %v876_v6  ;;  %v1005_v13 = vadd.f32 %v2600_v17, %v1004_v7 }
 0x192   : > { %v878_v10 = vpop.f32.mrf.mxu0  ;;  %v1006_v11 = vpop.f32.mrf.mxu1 }
 0x193   : > { %1956 = vst [vmem:[%s2607_s29 + $0x48] sm:$0xff] %v1836_v8   ;;  %1972 = vst [vmem:[%s2607_s29 + $0xc8] sm:$0xff] %v1916_v9   ;;  %v1071_v21 = vmax.f32 %v877_v12, 0.0  ;;  %v1103_v22 = vmax.f32 %v1005_v13, 0.0 }
 0x194   : > { %v879_v14 = vpop.f32.mrf.mxu0  ;;  %v1007_v15 = vpop.f32.mrf.mxu1 }
 0x195   : > { %v880_v16 = vadd.f32 %v2600_v17, %v879_v14  ;;  %v1008_v18 = vadd.f32 %v2600_v17, %v1007_v15 }
 0x196   : > { %v881_v19 = vpop.f32.mrf.mxu0  ;;  %v1009_v20 = vpop.f32.mrf.mxu1 }
 0x197   : > { %v1072_v23 = vmax.f32 %v880_v16, 0.0  ;;  %v1104_v24 = vmax.f32 %v1008_v18, 0.0 }
 0x198   : > { %v884_v25 = vpop.f32.mrf.mxu0  ;;  %v1012_v26 = vpop.f32.mrf.mxu1 }
 0x199   : > { %v1841_v27 = vpack.c.bf16 %v1072_v23, %v1071_v21  ;;  %v1921_v28 = vpack.c.bf16 %v1104_v24, %v1103_v22  ;;  %v885_v31 = vadd.f32 %v2600_v17, %v884_v25  ;;  %v1013_v32 = vadd.f32 %v2600_v17, %v1012_v26 }
 0x19a   : > { %v886_v29 = vpop.f32.mrf.mxu0  ;;  %v1014_v30 = vpop.f32.mrf.mxu1 }
 0x19b   : > { %1957 = vst [vmem:[%s2607_s29 + $0x50] sm:$0xff] %v1841_v27   ;;  %1973 = vst [vmem:[%s2607_s29 + $0xd0] sm:$0xff] %v1921_v28   ;;  %v1073_v39 = vmax.f32 %v885_v31, 0.0  ;;  %v1105_v40 = vmax.f32 %v1013_v32, 0.0 }
 0x19c   : > { %v887_v33 = vpop.f32.mrf.mxu0  ;;  %v1015_v34 = vpop.f32.mrf.mxu1 }
 0x19d   : > { %v888_v35 = vadd.f32 %v2600_v17, %v887_v33  ;;  %v1016_v36 = vadd.f32 %v2600_v17, %v1015_v34 }
 0x19e   : > { %v889_v37 = vpop.f32.mrf.mxu0  ;;  %v1017_v38 = vpop.f32.mrf.mxu1 }
 0x19f   : > { %v1074_v41 = vmax.f32 %v888_v35, 0.0  ;;  %v1106_v42 = vmax.f32 %v1016_v36, 0.0 }
 0x1a0   : > { %v892_v43 = vpop.f32.mrf.mxu0  ;;  %v1020_v44 = vpop.f32.mrf.mxu1 }
 0x1a1   : > { %v1846_v45 = vpack.c.bf16 %v1074_v41, %v1073_v39  ;;  %v1926_v46 = vpack.c.bf16 %v1106_v42, %v1105_v40  ;;  %v893_v49 = vadd.f32 %v2600_v17, %v892_v43  ;;  %v1021_v50 = vadd.f32 %v2600_v17, %v1020_v44 }
 0x1a2   : > { %v894_v47 = vpop.f32.mrf.mxu0  ;;  %v1022_v48 = vpop.f32.mrf.mxu1 }
 0x1a3   : > { %1958 = vst [vmem:[%s2607_s29 + $0x58] sm:$0xff] %v1846_v45   ;;  %1974 = vst [vmem:[%s2607_s29 + $0xd8] sm:$0xff] %v1926_v46   ;;  %v1075_v57 = vmax.f32 %v893_v49, 0.0  ;;  %v1107_v58 = vmax.f32 %v1021_v50, 0.0 }
 0x1a4   : > { %v895_v51 = vpop.f32.mrf.mxu0  ;;  %v1023_v52 = vpop.f32.mrf.mxu1 }
 0x1a5   : > { %v896_v53 = vadd.f32 %v2600_v17, %v895_v51  ;;  %v1024_v54 = vadd.f32 %v2600_v17, %v1023_v52 }
 0x1a6   : > { %v897_v55 = vpop.f32.mrf.mxu0  ;;  %v1025_v56 = vpop.f32.mrf.mxu1 }
 0x1a7   : > { %v1076_v59 = vmax.f32 %v896_v53, 0.0  ;;  %v1108_v60 = vmax.f32 %v1024_v54, 0.0 }
 0x1a8   : > { %v900_v61 = vpop.f32.mrf.mxu0  ;;  %v1028_v62 = vpop.f32.mrf.mxu1 }
 0x1a9   : > { %v1851_v63 = vpack.c.bf16 %v1076_v59, %v1075_v57  ;;  %v1931_v0 = vpack.c.bf16 %v1108_v60, %v1107_v58  ;;  %v901_v3 = vadd.f32 %v2600_v17, %v900_v61  ;;  %v1029_v4 = vadd.f32 %v2600_v17, %v1028_v62 }
 0x1aa   : > { %v902_v1 = vpop.f32.mrf.mxu0  ;;  %v1030_v2 = vpop.f32.mrf.mxu1 }
 0x1ab   : > { %1959 = vst [vmem:[%s2607_s29 + $0x60] sm:$0xff] %v1851_v63   ;;  %1975 = vst [vmem:[%s2607_s29 + $0xe0] sm:$0xff] %v1931_v0   ;;  %v1077_v11 = vmax.f32 %v901_v3, 0.0  ;;  %v1109_v12 = vmax.f32 %v1029_v4, 0.0 }
 0x1ac   : > { %v903_v5 = vpop.f32.mrf.mxu0  ;;  %v1031_v6 = vpop.f32.mrf.mxu1 }
 0x1ad   : > { %v904_v7 = vadd.f32 %v2600_v17, %v903_v5  ;;  %v1032_v8 = vadd.f32 %v2600_v17, %v1031_v6 }
 0x1ae   : > { %v905_v9 = vpop.f32.mrf.mxu0  ;;  %v1033_v10 = vpop.f32.mrf.mxu1 }
 0x1af   : > { %v1078_v13 = vmax.f32 %v904_v7, 0.0  ;;  %v1110_v14 = vmax.f32 %v1032_v8, 0.0 }
 0x1b0   : > { %v908_v15 = vpop.f32.mrf.mxu0  ;;  %v1036_v16 = vpop.f32.mrf.mxu1 }
 0x1b1   : > { %v1856_v18 = vpack.c.bf16 %v1078_v13, %v1077_v11  ;;  %v1936_v19 = vpack.c.bf16 %v1110_v14, %v1109_v12  ;;  %v909_v22 = vadd.f32 %v2600_v17, %v908_v15  ;;  %v1037_v23 = vadd.f32 %v2600_v17, %v1036_v16 }
 0x1b2   : > { %v910_v20 = vpop.f32.mrf.mxu0  ;;  %v1038_v21 = vpop.f32.mrf.mxu1 }
 0x1b3   : > { %1960 = vst [vmem:[%s2607_s29 + $0x68] sm:$0xff] %v1856_v18   ;;  %1976 = vst [vmem:[%s2607_s29 + $0xe8] sm:$0xff] %v1936_v19   ;;  %v1079_v30 = vmax.f32 %v909_v22, 0.0  ;;  %v1111_v31 = vmax.f32 %v1037_v23, 0.0 }
 0x1b4   : > { %v911_v24 = vpop.f32.mrf.mxu0  ;;  %v1039_v25 = vpop.f32.mrf.mxu1 }
 0x1b5   : > { %v912_v26 = vadd.f32 %v2600_v17, %v911_v24  ;;  %v1040_v27 = vadd.f32 %v2600_v17, %v1039_v25 }
 0x1b6   : > { %v913_v28 = vpop.f32.mrf.mxu0  ;;  %v1041_v29 = vpop.f32.mrf.mxu1 }
 0x1b7   : > { %v1080_v32 = vmax.f32 %v912_v26, 0.0  ;;  %v1112_v33 = vmax.f32 %v1040_v27, 0.0 }
 0x1b8   : > { %v916_v34 = vpop.f32.mrf.mxu0  ;;  %v1044_v35 = vpop.f32.mrf.mxu1 }
 0x1b9   : > { %v1861_v36 = vpack.c.bf16 %v1080_v32, %v1079_v30  ;;  %v1941_v37 = vpack.c.bf16 %v1112_v33, %v1111_v31  ;;  %v917_v40 = vadd.f32 %v2600_v17, %v916_v34  ;;  %v1045_v41 = vadd.f32 %v2600_v17, %v1044_v35 }
 0x1ba   : > { %v918_v38 = vpop.f32.mrf.mxu0  ;;  %v1046_v39 = vpop.f32.mrf.mxu1 }
 0x1bb   : > { %1961 = vst [vmem:[%s2607_s29 + $0x70] sm:$0xff] %v1861_v36   ;;  %1977 = vst [vmem:[%s2607_s29 + $0xf0] sm:$0xff] %v1941_v37   ;;  %v1081_v48 = vmax.f32 %v917_v40, 0.0  ;;  %v1113_v49 = vmax.f32 %v1045_v41, 0.0 }
 0x1bc   : > { %v919_v42 = vpop.f32.mrf.mxu0  ;;  %v1047_v43 = vpop.f32.mrf.mxu1 }
 0x1bd   : > { %v920_v44 = vadd.f32 %v2600_v17, %v919_v42  ;;  %v1048_v45 = vadd.f32 %v2600_v17, %v1047_v43 }
 0x1be   : > { %v921_v46 = vpop.f32.mrf.mxu0  ;;  %v1049_v47 = vpop.f32.mrf.mxu1 }
 0x1bf   : > { %v1082_v50 = vmax.f32 %v920_v44, 0.0  ;;  %v1114_v51 = vmax.f32 %v1048_v45, 0.0 }
 0x1c1   : > { %v1866_v17 = vpack.c.bf16 %v1082_v50, %v1081_v48  ;;  %v1946_v52 = vpack.c.bf16 %v1114_v51, %v1113_v49 }
 0x1c3   : > { %1962 = vst [vmem:[%s2607_s29 + $0x78] sm:$0xff] %v1866_v17   ;;  %1978 = vst [vmem:[%s2607_s29 + $0xf8] sm:$0xff] %v1946_v52  }
 0x1c4   : > { %2270 = shalt.err (!%p2267_p3)
}
 0x1c5   : > { %s2271_s26 = scalar_lea.hbm %s2704_s7, 4096  ;;  %s2275_s20 = scalar_lea.hbm %s2758_s3, 16384 }
 0x1c6   : > { %p2272_p5 = scmp.ne.s32.totalorder %s2704_s7, %s2271_s26  ;;  %p2276_p6 = scmp.lt.s32.totalorder %s2704_s7, %s2758_s3 }
 0x1c7   : > { %p2277_p11 = scmp.lt.s32.totalorder %s2275_s20, %s2271_s26 }
 0x1c8   : > { %p2273_p7 = pnand %p2272_p5, %p2769_p4 }
 0x1c9   : > { %p2278_p10 = por %p2277_p11, %p2276_p6 }
 0x1ca   : > { %p2274_p9 = pneg %p2273_p7 }
 0x1cc   : > { %p2279_p1 = pnand %p2278_p10, %p2274_p9 }
 0x1ce   : > { %2282 = shalt.err (!%p2279_p1)
}
 0x1cf   : > { %s2351_s29 = smov 64   ;;  %s2352_s4 = smov 4  }
 0x1d0   : > { %2017 = dma.vmem_to_hbm [thread:$0]  (%p2769_p4), %s2706_s21, 4096, %s2704_s7, %s1436_s15, %s2351_s29, %s2351_s29, %s2352_s4  }
 0x1d1 PF: > { %p2034_p8 = scmp.ge.s32.totalorder %s2341_s17, 2  ;;  %s1465_s5 = sand.u32 1, %s2321_s12  }
 0x1d2   : > { %p2770_p12 = scmp.ne.s32.totalorder %s2763_s23, 0  ;;  %s1466_s6 = scalar_lea.sflag [#allocation4], %s1465_s5 }
 0x1d4   : > { %p2028_p13 = pnand %p2034_p8, %p2770_p12 }
 0x1d6   : > { %p2029_p0 = pneg %p2028_p13 }
 0x1d8   : > { %2316 = dma.done.wait (%p2029_p0), %s1466_s6, 4096  }
 0x1d9   : > { %2318 = vsyncadd (%p2029_p0), %s1466_s6, 4294963200  ;;  %s20_s17 = sadd.s32 1, %s2341_s17   ;;  %s2771_s12 = smov %s2325_s13 }
 0x1da   : > { %p17_p2 = scmp.ge.s32.totalorder %s20_s17, 6   ;;  %s2772_s13 = smov %s2329_s14 }
 0x1db   : > { %s2773_s14 = smov %s2468_s19  ;;  %s2774_s15 = smov %s2337_s16 }
 0x1dc   : > { %s2775_s16 = smov %s2777_s28  ;;  %19 = sbr.rel (!%p17_p2) target bundleno = 7 (0x7), region = 85 }
 0x1e1   :  { %1471 = vsyncpa [#allocation3], 1 }
 0x1e2   :  { %1473 = vsyncpa [#allocation3 + $0x1], 1 }
 0x1e3   :  { %1474 = vsyncpa [#allocation6], 1 }
 0x1e4   :  { %1475 = vsyncpa [#allocation4], 1 }
 0x1e5   :  { %1477 = vsyncpa [#allocation4 + $0x1], 1 }

</bundles_post_ra>
